<compile_context>
chip_gen: v7x
topology: tpu7x:2x2x1
jax: 0.10.0
libtpu: 0.0.40
codegen_flags: <defaults>
</compile_context>

<pallas_src>
import functools

import jax
import jax.numpy as jnp
from jax.experimental import pallas as pl
from jax.experimental.pallas import tpu as pltpu


def _round_up(x, m):
    return (x + m - 1) // m * m


def actor_kernel(x_ref, w1_ref, b1_ref, w2_ref, b2_ref,
                 w3_ref, b3_ref, w4_ref, b4_ref, out_ref):
    # One batch tile per grid step.  Weights (bf16) are resident across steps
    # (their block index never changes, so Pallas only DMAs them once).
    # Activations are cast to bf16 only at the MXU input; the running value
    # `h` stays f32 (f32 accumulate + f32 bias/ReLU on VPU, tanh on EUP).
    x = x_ref[...]

    h = jnp.dot(x.astype(jnp.bfloat16), w1_ref[...],
                preferred_element_type=jnp.float32) + b1_ref[...]
    h = jnp.maximum(h, 0.0)

    h = jnp.dot(h.astype(jnp.bfloat16), w2_ref[...],
                preferred_element_type=jnp.float32) + b2_ref[...]
    h = jnp.maximum(h, 0.0)

    h = jnp.dot(h.astype(jnp.bfloat16), w3_ref[...],
                preferred_element_type=jnp.float32) + b3_ref[...]
    h = jnp.maximum(h, 0.0)

    a = jnp.dot(h.astype(jnp.bfloat16), w4_ref[...],
                preferred_element_type=jnp.float32) + b4_ref[...]
    out_ref[...] = jnp.tanh(a).astype(out_ref.dtype)


def _choose_batch_tile(B, max_block_b, split_threshold):
    """Pick a batch tile size.

    - Small/moderate batches: one tile (grid == 1) -> single pipeline step,
      no per-step overhead amortization needed, no batch-padding waste.
    - Larger batches: an even number (>= 2) of balanced tiles so that on v7x
      both TensorCores get equal work under the "parallel" grid axis; each
      tile capped at max_block_b.
    """
    if B <= split_threshold:
        return _round_up(B, 8)
    n_tiles = max(2, 2 * pl.cdiv(B, 2 * max_block_b))   # even, >= 2
    return _round_up(pl.cdiv(B, n_tiles), 8)


@functools.partial(
    jax.jit,
    static_argnames=("action_dim", "max_block_b", "split_threshold",
                     "out_dtype"))
def actor_forward(state, params, *, action_dim, max_block_b=512,
                  split_threshold=256, out_dtype=jnp.float32):
    """state: [B, state_dim] float32.

    params: (W1,b1,W2,b2,W3,b3,W4,b4) with W_i bf16 [in,out], b_i f32 [1,out];
    the last layer is pre-padded (at init time) so its out dim is a multiple
    of 128 with zero columns.  Returns [B, action_dim] actions in [-1, 1].
    """
    w1, b1, w2, b2, w3, b3, w4, b4 = params
    B, S = state.shape
    H = w1.shape[1]
    A_pad = w4.shape[1]          # already lane-padded to a multiple of 128

    TB = _choose_batch_tile(B, max_block_b, split_threshold)
    grid = (pl.cdiv(B, TB),)     # ragged edge block handled by Pallas masking

    def resident(shape):
        # Same block every grid step -> loaded from HBM once, stays resident
        # in VMEM for the whole call.
        return pl.BlockSpec(shape, lambda i: (0, 0))

    out = pl.pallas_call(
        actor_kernel,
        out_shape=jax.ShapeDtypeStruct((B, A_pad), out_dtype),
        grid=grid,
        in_specs=[
            pl.BlockSpec((TB, S), lambda i: (i, 0)),   # activations: batch-tiled
            resident((S, H)), resident((1, H)),
            resident((H, H)), resident((1, H)),
            resident((H, H)), resident((1, H)),
            resident((H, A_pad)), resident((1, A_pad)),
        ],
        out_specs=pl.BlockSpec((TB, A_pad), lambda i: (i, 0)),
        compiler_params=pltpu.CompilerParams(
            dimension_semantics=("parallel",)),        # v7x: shard batch over 2 TCs
    )(state, w1, b1, w2, b2, w3, b3, w4, b4)

    # Only the cheap lane slice remains per call (A_pad -> action_dim).
    return out[:, :action_dim]


def init_linear(key, fan_in, fan_out, pad_out_to=None):
    # Deterministic init mimicking PyTorch's default uniform(-1/sqrt(fan_in), +).
    kw, kb = jax.random.split(key)
    bound = 1.0 / jnp.sqrt(float(fan_in))
    w = jax.random.uniform(kw, (fan_in, fan_out), jnp.float32, -bound, bound)
    b = jax.random.uniform(kb, (1, fan_out), jnp.float32, -bound, bound)
    if pad_out_to is not None and pad_out_to > fan_out:
        # Init-time lane padding (zero cols -> padded lanes are tanh(0)=0).
        w = jnp.pad(w, ((0, 0), (0, pad_out_to - fan_out)))
        b = jnp.pad(b, ((0, 0), (0, pad_out_to - fan_out)))
    # Store weights in bf16 (HBM/MXU win); biases stay f32.
    return w.astype(jnp.bfloat16), b


def init_actor_params(key, state_dim, hidden_dim, action_dim):
    k1, k2, k3, k4 = jax.random.split(key, 4)
    a_pad = _round_up(action_dim, 128)
    w1, b1 = init_linear(k1, state_dim, hidden_dim)
    w2, b2 = init_linear(k2, hidden_dim, hidden_dim)
    w3, b3 = init_linear(k3, hidden_dim, hidden_dim)
    w4, b4 = init_linear(k4, hidden_dim, action_dim, pad_out_to=a_pad)
    return (w1, b1, w2, b2, w3, b3, w4, b4)


def reference_forward_bf16(state, params, action_dim):
    # Same arithmetic as the kernel: bf16 matmul inputs, f32 accumulation,
    # f32 bias / ReLU / tanh.
    w1, b1, w2, b2, w3, b3, w4, b4 = params

    def lin(x, w, b):
        return jnp.dot(x.astype(jnp.bfloat16), w,
                       preferred_element_type=jnp.float32) + b

    h = jnp.maximum(lin(state, w1, b1), 0.0)
    h = jnp.maximum(lin(h, w2, b2), 0.0)
    h = jnp.maximum(lin(h, w3, b3), 0.0)
    return jnp.tanh(lin(h, w4, b4))[:, :action_dim]


def reference_forward_f32(state, params, action_dim):
    # Full-f32 reference matching the original PyTorch module semantics.
    w1, b1, w2, b2, w3, b3, w4, b4 = params
    w1, w2, w3, w4 = (w.astype(jnp.float32) for w in (w1, w2, w3, w4))
    h = jnp.maximum(state @ w1 + b1, 0.0)
    h = jnp.maximum(h @ w2 + b2, 0.0)
    h = jnp.maximum(h @ w3 + b3, 0.0)
    return jnp.tanh(h @ w4 + b4)[:, :action_dim]


if __name__ == "__main__":
    # Small shapes consistent with the module (hidden_dim = 2**8 in the source).
    state_dim, hidden_dim, action_dim = 16, 256, 8

    key = jax.random.PRNGKey(0)
    k_state, k_big, k_params = jax.random.split(key, 3)
    params = init_actor_params(k_params, state_dim, hidden_dim, action_dim)

    fwd = functools.partial(actor_forward, action_dim=action_dim)

    # --- small rollout-style batch: single tile (grid=1), partial edge block ---
    batch = 4
    state = jax.random.normal(k_state, (batch, state_dim), jnp.float32)
    out = jax.block_until_ready(fwd(state, params))
    assert out.shape == (batch, action_dim)

    ref_bf16 = reference_forward_bf16(state, params, action_dim)
    ref_f32 = reference_forward_f32(state, params, action_dim)
    assert jnp.allclose(out, ref_bf16, atol=1e-3, rtol=1e-3), \
        "mismatch vs bf16-matched reference"
    assert jnp.allclose(out, ref_f32, atol=5e-2, rtol=5e-2), \
        "mismatch vs f32 reference"
    assert bool(jnp.all(jnp.abs(out) <= 1.0)), "tanh output out of range"

    # --- larger batch: even 2-tile grid (v7x megacore), ragged last block ---
    big_batch = 300
    big_state = jax.random.normal(k_big, (big_batch, state_dim), jnp.float32)
    big_out = jax.block_until_ready(fwd(big_state, params))
    assert big_out.shape == (big_batch, action_dim)
    big_ref = reference_forward_bf16(big_state, params, action_dim)
    assert jnp.allclose(big_out, big_ref, atol=1e-3, rtol=1e-3), \
        "mismatch vs bf16-matched reference (tiled batch)"
    assert bool(jnp.all(jnp.abs(big_out) <= 1.0)), "tanh output out of range"

    # TODO(synk): get_action's torch.randn_like exploration noise (and a fused
    # critic eval for rollout loops) not implemented here; could be fused into
    # this same pallas_call with pltpu.prng_seed / pltpu.prng_random_bits.
    print("KERNEL_OK")
</pallas_src>

<mosaic_0001>
module attributes {stable_mosaic.version = 11 : i64} {
  func.func @actor_kernel(%arg0: i32, %arg1: memref<8x16xf32, #tpu.memory_space<vmem>>, %arg2: memref<16x256xbf16, #tpu.memory_space<vmem>>, %arg3: memref<1x256xf32, #tpu.memory_space<vmem>>, %arg4: memref<256x256xbf16, #tpu.memory_space<vmem>>, %arg5: memref<1x256xf32, #tpu.memory_space<vmem>>, %arg6: memref<256x256xbf16, #tpu.memory_space<vmem>>, %arg7: memref<1x256xf32, #tpu.memory_space<vmem>>, %arg8: memref<256x128xbf16, #tpu.memory_space<vmem>>, %arg9: memref<1x128xf32, #tpu.memory_space<vmem>>, %arg10: memref<8x128xf32, #tpu.memory_space<vmem>>) attributes {dimension_semantics = [#tpu.dimension_semantics<parallel>], iteration_bounds = array<i64: 1>, scalar_prefetch = 0 : i64, scratch_operands = 0 : i64, tpu.core_type = #tpu.core_type<tc>, window_params = [{transform_indices = @transform_0, window_bounds = array<i64: 8, 16>}, {pipeline_mode = #tpu.pipeline_mode<synchronous>, transform_indices = @transform_1, window_bounds = array<i64: 16, 256>}, {pipeline_mode = #tpu.pipeline_mode<synchronous>, transform_indices = @transform_2, window_bounds = array<i64: 1, 256>}, {pipeline_mode = #tpu.pipeline_mode<synchronous>, transform_indices = @transform_3, window_bounds = array<i64: 256, 256>}, {pipeline_mode = #tpu.pipeline_mode<synchronous>, transform_indices = @transform_4, window_bounds = array<i64: 1, 256>}, {pipeline_mode = #tpu.pipeline_mode<synchronous>, transform_indices = @transform_5, window_bounds = array<i64: 256, 256>}, {pipeline_mode = #tpu.pipeline_mode<synchronous>, transform_indices = @transform_6, window_bounds = array<i64: 1, 256>}, {pipeline_mode = #tpu.pipeline_mode<synchronous>, transform_indices = @transform_7, window_bounds = array<i64: 256, 128>}, {pipeline_mode = #tpu.pipeline_mode<synchronous>, transform_indices = @transform_8, window_bounds = array<i64: 1, 128>}, {transform_indices = @transform_9, window_bounds = array<i64: 8, 128>}]} {
    %c0 = arith.constant 0 : index
    %c0_0 = arith.constant 0 : index
    %0 = vector.load %arg1[%c0, %c0_0] : memref<8x16xf32, #tpu.memory_space<vmem>>, vector<8x16xf32>
    %1 = arith.truncf %0 : vector<8x16xf32> to vector<8x16xbf16>
    %c0_1 = arith.constant 0 : index
    %c0_2 = arith.constant 0 : index
    %2 = vector.load %arg2[%c0_1, %c0_2] : memref<16x256xbf16, #tpu.memory_space<vmem>>, vector<16x256xbf16>
    %cst = arith.constant dense<0.000000e+00> : vector<8x256xf32>
    %3 = tpu.matmul %1, %2, %cst {dimension_numbers = #tpu.dot_dimension_numbers<[1], [0], [0], [1], [0, 0, 1, 1], [], []>} : vector<8x16xbf16>, vector<16x256xbf16>, vector<8x256xf32> -> vector<8x256xf32>
    %c0_3 = arith.constant 0 : index
    %c0_4 = arith.constant 0 : index
    %4 = vector.load %arg3[%c0_3, %c0_4] : memref<1x256xf32, #tpu.memory_space<vmem>>, vector<1x256xf32>
    %5 = vector.broadcast %4 : vector<1x256xf32> to vector<8x256xf32>
    %6 = arith.addf %3, %5 : vector<8x256xf32>
    %cst_5 = arith.constant 0.000000e+00 : f32
    %7 = vector.broadcast %cst_5 : f32 to vector<8x256xf32>
    %8 = arith.maximumf %6, %7 : vector<8x256xf32>
    %9 = arith.truncf %8 : vector<8x256xf32> to vector<8x256xbf16>
    %c0_6 = arith.constant 0 : index
    %c0_7 = arith.constant 0 : index
    %10 = vector.load %arg4[%c0_6, %c0_7] : memref<256x256xbf16, #tpu.memory_space<vmem>>, vector<256x256xbf16>
    %cst_8 = arith.constant dense<0.000000e+00> : vector<8x256xf32>
    %11 = tpu.matmul %9, %10, %cst_8 {dimension_numbers = #tpu.dot_dimension_numbers<[1], [0], [0], [1], [0, 0, 1, 1], [], []>} : vector<8x256xbf16>, vector<256x256xbf16>, vector<8x256xf32> -> vector<8x256xf32>
    %c0_9 = arith.constant 0 : index
    %c0_10 = arith.constant 0 : index
    %12 = vector.load %arg5[%c0_9, %c0_10] : memref<1x256xf32, #tpu.memory_space<vmem>>, vector<1x256xf32>
    %13 = vector.broadcast %12 : vector<1x256xf32> to vector<8x256xf32>
    %14 = arith.addf %11, %13 : vector<8x256xf32>
    %cst_11 = arith.constant 0.000000e+00 : f32
    %15 = vector.broadcast %cst_11 : f32 to vector<8x256xf32>
    %16 = arith.maximumf %14, %15 : vector<8x256xf32>
    %17 = arith.truncf %16 : vector<8x256xf32> to vector<8x256xbf16>
    %c0_12 = arith.constant 0 : index
    %c0_13 = arith.constant 0 : index
    %18 = vector.load %arg6[%c0_12, %c0_13] : memref<256x256xbf16, #tpu.memory_space<vmem>>, vector<256x256xbf16>
    %cst_14 = arith.constant dense<0.000000e+00> : vector<8x256xf32>
    %19 = tpu.matmul %17, %18, %cst_14 {dimension_numbers = #tpu.dot_dimension_numbers<[1], [0], [0], [1], [0, 0, 1, 1], [], []>} : vector<8x256xbf16>, vector<256x256xbf16>, vector<8x256xf32> -> vector<8x256xf32>
    %c0_15 = arith.constant 0 : index
    %c0_16 = arith.constant 0 : index
    %20 = vector.load %arg7[%c0_15, %c0_16] : memref<1x256xf32, #tpu.memory_space<vmem>>, vector<1x256xf32>
    %21 = vector.broadcast %20 : vector<1x256xf32> to vector<8x256xf32>
    %22 = arith.addf %19, %21 : vector<8x256xf32>
    %cst_17 = arith.constant 0.000000e+00 : f32
    %23 = vector.broadcast %cst_17 : f32 to vector<8x256xf32>
    %24 = arith.maximumf %22, %23 : vector<8x256xf32>
    %25 = arith.truncf %24 : vector<8x256xf32> to vector<8x256xbf16>
    %c0_18 = arith.constant 0 : index
    %c0_19 = arith.constant 0 : index
    %26 = vector.load %arg8[%c0_18, %c0_19] : memref<256x128xbf16, #tpu.memory_space<vmem>>, vector<256x128xbf16>
    %cst_20 = arith.constant dense<0.000000e+00> : vector<8x128xf32>
    %27 = tpu.matmul %25, %26, %cst_20 {dimension_numbers = #tpu.dot_dimension_numbers<[1], [0], [0], [1], [0, 0, 1, 1], [], []>} : vector<8x256xbf16>, vector<256x128xbf16>, vector<8x128xf32> -> vector<8x128xf32>
    %c0_21 = arith.constant 0 : index
    %c0_22 = arith.constant 0 : index
    %28 = vector.load %arg9[%c0_21, %c0_22] : memref<1x128xf32, #tpu.memory_space<vmem>>, vector<1x128xf32>
    %29 = vector.broadcast %28 : vector<1x128xf32> to vector<8x128xf32>
    %30 = arith.addf %27, %29 : vector<8x128xf32>
    %31 = math.tanh %30 : vector<8x128xf32>
    %c0_23 = arith.constant 0 : index
    %c0_24 = arith.constant 0 : index
    %32 = vector.load %arg10[%c0_23, %c0_24] : memref<8x128xf32, #tpu.memory_space<vmem>>, vector<8x128xf32>
    tpu.vector_store %arg10[%c0_23, %c0_24], %31 {strides = array<i32>} : memref<8x128xf32, #tpu.memory_space<vmem>>, vector<8x128xf32>,
    return
  }
  func.func @transform_0(%arg0: i32) -> (i32, i32) {
    %c0_i32 = arith.constant 0 : i32
    %c0_i32_0 = arith.constant 0 : i32
    return %arg0, %c0_i32 : i32, i32
  }
  func.func @transform_1(%arg0: i32) -> (i32, i32) {
    %c0_i32 = arith.constant 0 : i32
    %c0_i32_0 = arith.constant 0 : i32
    %c0_i32_1 = arith.constant 0 : i32
    return %c0_i32, %c0_i32_0 : i32, i32
  }
  func.func @transform_2(%arg0: i32) -> (i32, i32) {
    %c0_i32 = arith.constant 0 : i32
    %c0_i32_0 = arith.constant 0 : i32
    %c0_i32_1 = arith.constant 0 : i32
    return %c0_i32, %c0_i32_0 : i32, i32
  }
  func.func @transform_3(%arg0: i32) -> (i32, i32) {
    %c0_i32 = arith.constant 0 : i32
    %c0_i32_0 = arith.constant 0 : i32
    %c0_i32_1 = arith.constant 0 : i32
    return %c0_i32, %c0_i32_0 : i32, i32
  }
  func.func @transform_4(%arg0: i32) -> (i32, i32) {
    %c0_i32 = arith.constant 0 : i32
    %c0_i32_0 = arith.constant 0 : i32
    %c0_i32_1 = arith.constant 0 : i32
    return %c0_i32, %c0_i32_0 : i32, i32
  }
  func.func @transform_5(%arg0: i32) -> (i32, i32) {
    %c0_i32 = arith.constant 0 : i32
    %c0_i32_0 = arith.constant 0 : i32
    %c0_i32_1 = arith.constant 0 : i32
    return %c0_i32, %c0_i32_0 : i32, i32
  }
  func.func @transform_6(%arg0: i32) -> (i32, i32) {
    %c0_i32 = arith.constant 0 : i32
    %c0_i32_0 = arith.constant 0 : i32
    %c0_i32_1 = arith.constant 0 : i32
    return %c0_i32, %c0_i32_0 : i32, i32
  }
  func.func @transform_7(%arg0: i32) -> (i32, i32) {
    %c0_i32 = arith.constant 0 : i32
    %c0_i32_0 = arith.constant 0 : i32
    %c0_i32_1 = arith.constant 0 : i32
    return %c0_i32, %c0_i32_0 : i32, i32
  }
  func.func @transform_8(%arg0: i32) -> (i32, i32) {
    %c0_i32 = arith.constant 0 : i32
    %c0_i32_0 = arith.constant 0 : i32
    %c0_i32_1 = arith.constant 0 : i32
    return %c0_i32, %c0_i32_0 : i32, i32
  }
  func.func @transform_9(%arg0: i32) -> (i32, i32) {
    %c0_i32 = arith.constant 0 : i32
    %c0_i32_0 = arith.constant 0 : i32
    return %arg0, %c0_i32 : i32, i32
  }
}

</mosaic_0001>

<bundles_post_ra>
// kernel: actor_forward.1
= control target key start
LH: loop header
LB: loop body
LE: loop exit
PB: predicated region body
PF: predicated region fallthrough
CT: control target
= control target key end

     0   :  { %14 = vsyncpa [#allocation3], 0  ;;  %s1418_s0 = inlined_call_operand.hbm [shape: f32[4,16], index: 0, kind: input, shape index: {}]   ;;  %s1419_s1 = inlined_call_operand.hbm [shape: bf16[16,256], index: 1, kind: input, shape index: {}]   ;;  %s1420_s2 = inlined_call_operand.vmem [shape: f32[1,256], index: 2, kind: input, shape index: {}]   ;;  %s1421_s3 = inlined_call_operand.hbm [shape: bf16[256,256], index: 3, kind: input, shape index: {}]   ;;  %s1422_s4 = inlined_call_operand.vmem [shape: f32[1,256], index: 4, kind: input, shape index: {}]   ;;  %s1423_s5 = inlined_call_operand.hbm [shape: bf16[256,256], index: 5, kind: input, shape index: {}]   ;;  %s1424_s6 = inlined_call_operand.vmem [shape: f32[1,256], index: 6, kind: input, shape index: {}]   ;;  %s1425_s7 = inlined_call_operand.hbm [shape: bf16[256,128], index: 7, kind: input, shape index: {}]   ;;  %s1426_s8 = inlined_call_operand.vmem [shape: f32[1,128], index: 8, kind: input, shape index: {}]   ;;  %s1427_s9 = inlined_call_operand.hbm [shape: f32[4,128], index: 9, kind: output, shape index: {}]  }
   0x1   :  { %15 = vsyncpa [#allocation6], 0 }
   0x2   :  { %16 = vsyncpa [#allocation9], 0 }
   0x3   :  { %17 = vsyncpa [#allocation4], 0 }
   0x4   :  { %22 = vsyncadd [#allocation3], 64  ;;  %s1245_s30 = smov [#allocation5]   ;;  %s1105_s13 = scalar_lea.hbm %s1419_s1, 256 }
   0x5   :  { %s35_s10 = sshll.u32 %s1245_s30, 4  ;;  %p1106_p0 = scmp.ne.s32.totalorder %s1419_s1, %s1105_s13  ;;  %s36_s10 = int_to_ptr.vmem [resolvable:$true] %s35_s10 }
   0x6   :  { %p1109_p1 = scmp.lt.u32.totalorder %s1105_s13, %s1419_s1 }
   0x8   :  { %p1111_p2 = pnand %p1109_p1, %p1106_p0 }
   0xa   :  { %1114 = shalt.err (!%p1111_p2)
}
   0xb   :  { %s1115_s18 = scalar_lea.vmem %s36_s10, 256  ;;  %p1120_p4 = scmp.lt.s32.totalorder %s36_s10, %s36_s10 }
   0xc   :  { %p1116_p3 = scmp.ne.s32.totalorder %s36_s10, %s1115_s18  ;;  %p1121_p5 = scmp.lt.s32.totalorder %s1115_s18, %s1115_s18 }
   0xe   :  { %p1122_p6 = por %p1121_p5, %p1120_p4 }
  0x10   :  { %p1123_p7 = pnand %p1122_p6, %p1116_p3 }
  0x12   :  { %1126 = shalt.err (!%p1123_p7)
}
  0x13   :  { %s1246_s19 = smov 128   ;;  %s1247_s20 = smov 8  }
  0x14   :  { %41 = dma.hbm_to_vmem [thread:$0]  %s1419_s1, 256, %s36_s10, [#allocation6], %s1246_s19, %s1246_s19, %s1247_s20  }
  0x15   :  { %s1248_s23 = smov [#allocation8]   ;;  %s1249_s25 = smov [#allocation2]  }
  0x16   :  { %s63_s24 = sshll.u32 %s1248_s23, 4  ;;  %s23_s26 = sshll.u32 %s1249_s25, 4  ;;  %s64_s24 = int_to_ptr.vmem [resolvable:$true] %s63_s24  ;;  %s24_s26 = int_to_ptr.vmem [resolvable:$true] %s23_s26 }
  0x17   :  { %s1127_s29 = scalar_lea.hbm %s1423_s5, 4096 }
  0x18   :  { %p1128_p8 = scmp.ne.s32.totalorder %s1423_s5, %s1127_s29  ;;  %p1131_p9 = scmp.lt.u32.totalorder %s1127_s29, %s1423_s5 }
  0x1a   :  { %p1133_p10 = pnand %p1131_p9, %p1128_p8 }
  0x1c   :  { %1136 = shalt.err (!%p1133_p10)
}
  0x1d   :  { %s1137_s1 = scalar_lea.vmem %s64_s24, 4096  ;;  %p1142_p12 = scmp.lt.s32.totalorder %s64_s24, %s64_s24 }
  0x1e   :  { %p1138_p11 = scmp.ne.s32.totalorder %s64_s24, %s1137_s1  ;;  %p1143_p13 = scmp.lt.s32.totalorder %s1137_s1, %s1137_s1 }
  0x20   :  { %p1144_p0 = por %p1143_p13, %p1142_p12 }
  0x22   :  { %p1145_p1 = pnand %p1144_p0, %p1138_p11 }
  0x24   :  { %1148 = shalt.err (!%p1145_p1)
}
  0x25   :  { %69 = dma.hbm_to_vmem [thread:$0]  %s1423_s5, 4096, %s64_s24, [#allocation9], %s1246_s19, %s1246_s19, %s1247_s20  }
  0x26   :  { %s1149_s17 = scalar_lea.hbm %s1418_s0, 64 }
  0x27   :  { %p1150_p2 = scmp.ne.s32.totalorder %s1418_s0, %s1149_s17  ;;  %p1153_p3 = scmp.lt.u32.totalorder %s1149_s17, %s1418_s0 }
  0x29   :  { %p1155_p4 = pnand %p1153_p3, %p1150_p2 }
  0x2b   :  { %1158 = shalt.err (!%p1155_p4)
}
  0x2c   :  { %s1159_s25 = scalar_lea.vmem %s24_s26, 64  ;;  %s1163_s27 = scalar_lea.vmem %s24_s26, 128 }
  0x2d   :  { %p1160_p5 = scmp.ne.s32.totalorder %s24_s26, %s1159_s25  ;;  %p1164_p6 = scmp.lt.s32.totalorder %s24_s26, %s24_s26 }
  0x2e   :  { %p1165_p7 = scmp.lt.s32.totalorder %s1163_s27, %s1159_s25 }
  0x30   :  { %p1166_p8 = por %p1165_p7, %p1164_p6 }
  0x32   :  { %p1167_p9 = pnand %p1166_p8, %p1160_p5 }
  0x34   :  { %1170 = shalt.err (!%p1167_p9)
}
  0x35   :  { %s1250_s5 = smov 64   ;;  %s1251_s24 = smov 4  }
  0x36   :  { %29 = dma.hbm_to_vmem [thread:$0]  %s1418_s0, 64, %s24_s26, [#allocation3], %s1250_s5, %s1250_s5, %s1251_s24  }
  0x37   :  { %s1252_s30 = smov [#allocation7]   ;;  %s1253_s12 = smov [#allocation10]  }
  0x38   :  { %s49_s11 = sshll.u32 %s1252_s30, 4  ;;  %s77_s13 = sshll.u32 %s1253_s12, 4  ;;  %s50_s11 = int_to_ptr.vmem [resolvable:$true] %s49_s11  ;;  %s78_s13 = int_to_ptr.vmem [resolvable:$true] %s77_s13 }
  0x39   :  { %s1171_s14 = scalar_lea.hbm %s1421_s3, 4096 }
  0x3a   :  { %p1172_p10 = scmp.ne.s32.totalorder %s1421_s3, %s1171_s14  ;;  %p1175_p11 = scmp.lt.u32.totalorder %s1171_s14, %s1421_s3 }
  0x3c   :  { %p1177_p12 = pnand %p1175_p11, %p1172_p10 }
  0x3e   :  { %1180 = shalt.err (!%p1177_p12)
}
  0x3f   :  { %s1181_s0 = scalar_lea.vmem %s50_s11, 4096  ;;  %p1186_p0 = scmp.lt.s32.totalorder %s50_s11, %s50_s11 }
  0x40   :  { %p1182_p13 = scmp.ne.s32.totalorder %s50_s11, %s1181_s0  ;;  %p1187_p1 = scmp.lt.s32.totalorder %s1181_s0, %s1181_s0 }
  0x42   :  { %p1188_p2 = por %p1187_p1, %p1186_p0 }
  0x44   :  { %p1189_p3 = pnand %p1188_p2, %p1182_p13 }
  0x46   :  { %1192 = shalt.err (!%p1189_p3)
}
  0x47   :  { %55 = dma.hbm_to_vmem [thread:$0]  %s1421_s3, 4096, %s50_s11, [#allocation6], %s1246_s19, %s1246_s19, %s1247_s20  }
  0x48   :  { %s1193_s25 = scalar_lea.hbm %s1425_s7, 2048 }
  0x49   :  { %p1194_p4 = scmp.ne.s32.totalorder %s1425_s7, %s1193_s25  ;;  %p1197_p5 = scmp.lt.u32.totalorder %s1193_s25, %s1425_s7 }
  0x4b   :  { %p1199_p6 = pnand %p1197_p5, %p1194_p4 }
  0x4d   :  { %1202 = shalt.err (!%p1199_p6)
}
  0x4e   :  { %s1203_s12 = scalar_lea.vmem %s78_s13, 2048  ;;  %p1208_p8 = scmp.lt.s32.totalorder %s78_s13, %s78_s13 }
  0x4f   :  { %p1204_p7 = scmp.ne.s32.totalorder %s78_s13, %s1203_s12  ;;  %p1209_p9 = scmp.lt.s32.totalorder %s1203_s12, %s1203_s12 }
  0x51   :  { %p1210_p10 = por %p1209_p9, %p1208_p8 }
  0x53   :  { %p1211_p11 = pnand %p1210_p10, %p1204_p7 }
  0x55   :  { %1214 = shalt.err (!%p1211_p11)
}
  0x56   :  { %83 = dma.hbm_to_vmem [thread:$0]  %s1425_s7, 2048, %s78_s13, [#allocation9], %s1250_s5, %s1250_s5, %s1251_s24  }
  0x57   :  { %1237 = dma.done.wait [#allocation3], 128  }
  0x58   :  { %1238 = vsyncadd [#allocation3], 4294967168 }
  0x59   :  { %1239 = dma.done.wait [#allocation6], 4352  }
  0x5a   :  { %1240 = vsyncadd [#allocation6], 4294962944 }
  0x5b   :  { %1241 = dma.done.wait [#allocation9], 6144  }
  0x5c   :  { %1242 = vsyncadd [#allocation9], 4294961152  ;;  %v1254_v0 = vmov 0   ;;  %v988_v1 = vld [vmem:[#allocation5 + $0x4] ss:$8 sps:$4 sm:$0xff]   ;;  %v102_v3 = vld [vmem:[#allocation2] sm:$0xff] }
  0x5d   :  { %164 = vmatprep.mubr.bf16.mxu0 %v1254_v0  ;;  %v990_v2 = vld [vmem:[#allocation5] ss:$8 sps:$4 sm:$0xff]   ;;  %132 = vmatprep.subr.bf16.mxu0 %v988_v1  ;;  %v103_v4 = vpack.c.bf16 %v102_v3, %v102_v3  ;;  %v991_v5 = vld [vmem:[#allocation7 + $0x4] ss:$8 sps:$4 sm:$0xff]   ;;  %v993_v6 = vld [vmem:[#allocation7] ss:$8 sps:$4 sm:$0xff]   ;;  %v108_v1 = vlaneseq }
  0x5e   :  { %133 = vmatpush1.bf16.msra.mxu0 %v990_v2  ;;  %vm128_vm0 = vcmask 130048   ;;  %v994_v7 = vld [vmem:[#allocation7 + $0x14] ss:$8 sps:$4 sm:$0xff]   ;;  %381 = vmatprep.subr.bf16.mxu1 %v991_v5  ;;  %v996_v8 = vld [vmem:[#allocation7 + $0x10] ss:$8 sps:$4 sm:$0xff]  }
  0x5f   :  { %382 = vmatpush1.bf16.msra.mxu1 %v993_v6  ;;  %v997_v9 = vld [vmem:[#allocation7 + $0x24] ss:$8 sps:$4 sm:$0xff]   ;;  %v999_v10 = vld [vmem:[#allocation7 + $0x20] ss:$8 sps:$4 sm:$0xff]   ;;  %v1000_v11 = vld [vmem:[#allocation7 + $0x34] ss:$8 sps:$4 sm:$0xff]  }
  0x60   :  { %383 = vmatprep.subr.bf16.mxu1 %v994_v7  ;;  %v1002_v12 = vld [vmem:[#allocation7 + $0x30] ss:$8 sps:$4 sm:$0xff]   ;;  %v1003_v13 = vld [vmem:[#allocation7 + $0x44] ss:$8 sps:$4 sm:$0xff]   ;;  %v1005_v14 = vld [vmem:[#allocation7 + $0x40] ss:$8 sps:$4 sm:$0xff]  }
  0x61   :  { %873 = vmatmul.mubr.msk.bf16.vlgmr.msra.gmra.mrb[0].mxu0 %vm128_vm0, %v103_v4  ;;  %v1006_v15 = vld [vmem:[#allocation7 + $0x54] ss:$8 sps:$4 sm:$0xff]   ;;  %v1008_v16 = vld [vmem:[#allocation7 + $0x50] ss:$8 sps:$4 sm:$0xff]   ;;  %v1009_v17 = vld [vmem:[#allocation7 + $0x64] ss:$8 sps:$4 sm:$0xff]  }
  0x62   :  { %v1011_v18 = vld [vmem:[#allocation7 + $0x60] ss:$8 sps:$4 sm:$0xff]   ;;  %v1012_v19 = vld [vmem:[#allocation7 + $0x74] ss:$8 sps:$4 sm:$0xff]   ;;  %v1014_v20 = vld [vmem:[#allocation7 + $0x70] ss:$8 sps:$4 sm:$0xff]  }
  0x63   :  { %384 = vmatpush1.bf16.msra.mxu1 %v996_v8  ;;  %v1015_v21 = vld [vmem:[#allocation7 + $0x84] ss:$8 sps:$4 sm:$0xff]   ;;  %v1017_v22 = vld [vmem:[#allocation7 + $0x80] ss:$8 sps:$4 sm:$0xff]   ;;  %v1018_v23 = vld [vmem:[#allocation7 + $0x94] ss:$8 sps:$4 sm:$0xff]  }
  0x64   :  { %385 = vmatprep.subr.bf16.mxu1 %v997_v9  ;;  %v1020_v24 = vld [vmem:[#allocation7 + $0x90] ss:$8 sps:$4 sm:$0xff]   ;;  %v1021_v25 = vld [vmem:[#allocation7 + $0xa4] ss:$8 sps:$4 sm:$0xff]   ;;  %v1023_v26 = vld [vmem:[#allocation7 + $0xa0] ss:$8 sps:$4 sm:$0xff]  }
  0x65   :  { %v1024_v27 = vld [vmem:[#allocation7 + $0xb4] ss:$8 sps:$4 sm:$0xff]   ;;  %v1026_v28 = vld [vmem:[#allocation7 + $0xb0] ss:$8 sps:$4 sm:$0xff]   ;;  %v1027_v29 = vld [vmem:[#allocation7 + $0xc4] ss:$8 sps:$4 sm:$0xff]  }
  0x66   :  { %v1029_v30 = vld [vmem:[#allocation7 + $0xc0] ss:$8 sps:$4 sm:$0xff]   ;;  %v1030_v31 = vld [vmem:[#allocation7 + $0xd4] ss:$8 sps:$4 sm:$0xff]   ;;  %v1032_v32 = vld [vmem:[#allocation7 + $0xd0] ss:$8 sps:$4 sm:$0xff]  }
  0x67   :  { %386 = vmatpush1.bf16.msra.mxu1 %v999_v10  ;;  %v1033_v33 = vld [vmem:[#allocation7 + $0xe4] ss:$8 sps:$4 sm:$0xff]   ;;  %v1035_v34 = vld [vmem:[#allocation7 + $0xe0] ss:$8 sps:$4 sm:$0xff]   ;;  %v1036_v35 = vld [vmem:[#allocation7 + $0xf4] ss:$8 sps:$4 sm:$0xff]  }
  0x68   :  { %387 = vmatprep.subr.bf16.mxu1 %v1000_v11  ;;  %v1038_v36 = vld [vmem:[#allocation7 + $0xf0] ss:$8 sps:$4 sm:$0xff]   ;;  %v1039_v37 = vld [vmem:[#allocation8] ss:$8 sps:$4 sm:$0xff]   ;;  %v1041_v38 = vld [vmem:[#allocation8 + $0x4] ss:$8 sps:$4 sm:$0xff]  }
  0x69   :  { %v1044_v39 = vld [vmem:[#allocation8 + $0x14] ss:$8 sps:$4 sm:$0xff]   ;;  %630 = vmatprep.subr.bf16.mxu0 %v1041_v38  ;;  %v1042_v40 = vld [vmem:[#allocation8 + $0x10] ss:$8 sps:$4 sm:$0xff]   ;;  %v1047_v41 = vld [vmem:[#allocation8 + $0x24] ss:$8 sps:$4 sm:$0xff]  }
  0x6a   :  { %631 = vmatpush1.bf16.msra.mxu0 %v1039_v37  ;;  %v1045_v42 = vld [vmem:[#allocation8 + $0x20] ss:$8 sps:$4 sm:$0xff]   ;;  %v1050_v43 = vld [vmem:[#allocation8 + $0x34] ss:$8 sps:$4 sm:$0xff]   ;;  %v1048_v44 = vld [vmem:[#allocation8 + $0x30] ss:$8 sps:$4 sm:$0xff]  }
  0x6b   :  { %388 = vmatpush1.bf16.msra.mxu1 %v1002_v12  ;;  %632 = vmatprep.subr.bf16.mxu0 %v1044_v39  ;;  %v1053_v45 = vld [vmem:[#allocation8 + $0x44] ss:$8 sps:$4 sm:$0xff]   ;;  %v1051_v46 = vld [vmem:[#allocation8 + $0x40] ss:$8 sps:$4 sm:$0xff]   ;;  %v1056_v47 = vld [vmem:[#allocation8 + $0x54] ss:$8 sps:$4 sm:$0xff]  }
  0x6c   :  { %389 = vmatprep.subr.bf16.mxu1 %v1003_v13  ;;  %v1054_v48 = vld [vmem:[#allocation8 + $0x50] ss:$8 sps:$4 sm:$0xff]   ;;  %v1059_v49 = vld [vmem:[#allocation8 + $0x64] ss:$8 sps:$4 sm:$0xff]   ;;  %v1057_v50 = vld [vmem:[#allocation8 + $0x60] ss:$8 sps:$4 sm:$0xff]  }
  0x6d   :  { %v1062_v51 = vld [vmem:[#allocation8 + $0x74] ss:$8 sps:$4 sm:$0xff]   ;;  %v1060_v52 = vld [vmem:[#allocation8 + $0x70] ss:$8 sps:$4 sm:$0xff]   ;;  %v1065_v53 = vld [vmem:[#allocation8 + $0x84] ss:$8 sps:$4 sm:$0xff]  }
  0x6e   :  { %633 = vmatpush1.bf16.msra.mxu0 %v1042_v40  ;;  %v1063_v54 = vld [vmem:[#allocation8 + $0x80] ss:$8 sps:$4 sm:$0xff]   ;;  %v1068_v55 = vld [vmem:[#allocation8 + $0x94] ss:$8 sps:$4 sm:$0xff]   ;;  %v1066_v56 = vld [vmem:[#allocation8 + $0x90] ss:$8 sps:$4 sm:$0xff]  }
  0x6f   :  { %390 = vmatpush1.bf16.msra.mxu1 %v1005_v14  ;;  %634 = vmatprep.subr.bf16.mxu0 %v1047_v41  ;;  %v1071_v57 = vld [vmem:[#allocation8 + $0xa4] ss:$8 sps:$4 sm:$0xff]   ;;  %v1069_v58 = vld [vmem:[#allocation8 + $0xa0] ss:$8 sps:$4 sm:$0xff]   ;;  %v1074_v59 = vld [vmem:[#allocation8 + $0xb4] ss:$8 sps:$4 sm:$0xff]  }
  0x70   :  { %391 = vmatprep.subr.bf16.mxu1 %v1006_v15  ;;  %v1072_v60 = vld [vmem:[#allocation8 + $0xb0] ss:$8 sps:$4 sm:$0xff]   ;;  %v1077_v61 = vld [vmem:[#allocation8 + $0xc4] ss:$8 sps:$4 sm:$0xff]   ;;  %v1075_v62 = vld [vmem:[#allocation8 + $0xc0] ss:$8 sps:$4 sm:$0xff]  }
  0x71   :  { %v1080_v63 = vld [vmem:[#allocation8 + $0xd4] ss:$8 sps:$4 sm:$0xff]   ;;  %v1078_v0 = vld [vmem:[#allocation8 + $0xd0] ss:$8 sps:$4 sm:$0xff]   ;;  %v109_v2 = vshrl.u32 %v108_v1, 7 }
  0x72   :  { %635 = vmatpush1.bf16.msra.mxu0 %v1045_v42  ;;  %v106_v4 = vld [vmem:[%s1420_s2] sm:$0x3] }
  0x73   :  { %392 = vmatpush1.bf16.msra.mxu1 %v1008_v16  ;;  %636 = vmatprep.subr.bf16.mxu0 %v1050_v43  ;;  %v1381_v3 = vsub.s32 0, %v109_v2  ;;  %v1386_v5 = vsub.s32 1, %v109_v2  ;;  %v938_v1 = vld [vmem:[%s1426_s8] ss:$0 sm:$0xff] }
  0x74   :  { %393 = vmatprep.subr.bf16.mxu1 %v1009_v17 }
  0x75   :  { %v111_v6 = vrot.slane %v106_v4, %v1381_v3  ;;  %v115_v7 = vrot.slane %v106_v4, %v1386_v5 }
  0x76   :  { %637 = vmatpush1.bf16.msra.mxu0 %v1048_v44 }
  0x77   :  { %394 = vmatpush1.bf16.msra.mxu1 %v1011_v18  ;;  %638 = vmatprep.subr.bf16.mxu0 %v1053_v45  ;;  %v1083_v18 = vld [vmem:[#allocation8 + $0xe4] ss:$8 sps:$4 sm:$0xff]  }
  0x78   :  { %395 = vmatprep.subr.bf16.mxu1 %v1012_v19  ;;  %v1081_v19 = vld [vmem:[#allocation8 + $0xe0] ss:$8 sps:$4 sm:$0xff]  }
  0x7a   :  { %639 = vmatpush1.bf16.msra.mxu0 %v1051_v46 }
  0x7b   :  { %396 = vmatpush1.bf16.msra.mxu1 %v1014_v20  ;;  %640 = vmatprep.subr.bf16.mxu0 %v1056_v47  ;;  %v1086_v20 = vld [vmem:[#allocation8 + $0xf4] ss:$8 sps:$4 sm:$0xff]  }
  0x7c   :  { %397 = vmatprep.subr.bf16.mxu1 %v1015_v21  ;;  %v1084_v21 = vld [vmem:[#allocation8 + $0xf0] ss:$8 sps:$4 sm:$0xff]  }
  0x7d   :  { %v1099_v47 = vld [vmem:[#allocation10 + $0x70] sm:$0xff]  }
  0x7e   :  { %641 = vmatpush1.bf16.msra.mxu0 %v1054_v48  ;;  %v1100_v48 = vld [vmem:[#allocation10 + $0x30] sm:$0xff]  }
  0x7f   :  { %398 = vmatpush1.bf16.msra.mxu1 %v1017_v22  ;;  %642 = vmatprep.subr.bf16.mxu0 %v1059_v49  ;;  %v1087_v22 = vld [vmem:[#allocation10 + $0x40] sm:$0xff]   ;;  %v1101_v49 = vld [vmem:[#allocation10 + $0x78] sm:$0xff]  }
  0x80   :  { %399 = vmatprep.subr.bf16.mxu1 %v1018_v23  ;;  %v1088_v23 = vld [vmem:[#allocation10] sm:$0xff]  }
  0x82   :  { %643 = vmatpush1.bf16.msra.mxu0 %v1057_v50  ;;  %v1102_v50 = vld [vmem:[#allocation10 + $0x38] sm:$0xff]  }
  0x83   :  { %400 = vmatpush1.bf16.msra.mxu1 %v1020_v24  ;;  %644 = vmatprep.subr.bf16.mxu0 %v1062_v51  ;;  %v1089_v24 = vld [vmem:[#allocation10 + $0x48] sm:$0xff]  }
  0x84   :  { %401 = vmatprep.subr.bf16.mxu1 %v1021_v25  ;;  %v1090_v25 = vld [vmem:[#allocation10 + $0x8] sm:$0xff]  }
  0x85   :  { %v458_v51 = vld [vmem:[%s1424_s6] sm:$0x3] }
  0x86   :  { %645 = vmatpush1.bf16.msra.mxu0 %v1060_v52  ;;  %v463_v52 = vrot.slane %v458_v51, %v1381_v3 }
  0x87   :  { %402 = vmatpush1.bf16.msra.mxu1 %v1023_v26  ;;  %646 = vmatprep.subr.bf16.mxu0 %v1065_v53  ;;  %v1091_v26 = vld [vmem:[#allocation10 + $0x50] sm:$0xff]   ;;  %v467_v53 = vrot.slane %v458_v51, %v1386_v5 }
  0x88   :  { %403 = vmatprep.subr.bf16.mxu1 %v1024_v27  ;;  %v1092_v27 = vld [vmem:[#allocation10 + $0x10] sm:$0xff]  }
  0x8a   :  { %647 = vmatpush1.bf16.msra.mxu0 %v1063_v54 }
  0x8b   :  { %404 = vmatpush1.bf16.msra.mxu1 %v1026_v28  ;;  %648 = vmatprep.subr.bf16.mxu0 %v1068_v55  ;;  %v1093_v28 = vld [vmem:[#allocation10 + $0x58] sm:$0xff]  }
  0x8c   :  { %405 = vmatprep.subr.bf16.mxu1 %v1027_v29  ;;  %v1094_v29 = vld [vmem:[#allocation10 + $0x18] sm:$0xff]  }
  0x8e   :  { %649 = vmatpush1.bf16.msra.mxu0 %v1066_v56 }
  0x8f   :  { %406 = vmatpush1.bf16.msra.mxu1 %v1029_v30  ;;  %650 = vmatprep.subr.bf16.mxu0 %v1071_v57  ;;  %v1095_v30 = vld [vmem:[#allocation10 + $0x60] sm:$0xff]  }
  0x90   :  { %407 = vmatprep.subr.bf16.mxu1 %v1030_v31  ;;  %v1096_v31 = vld [vmem:[#allocation10 + $0x20] sm:$0xff]  }
  0x92   :  { %651 = vmatpush1.bf16.msra.mxu0 %v1069_v58 }
  0x93   :  { %408 = vmatpush1.bf16.msra.mxu1 %v1032_v32  ;;  %652 = vmatprep.subr.bf16.mxu0 %v1074_v59  ;;  %v1097_v32 = vld [vmem:[#allocation10 + $0x68] sm:$0xff]  }
  0x94   :  { %409 = vmatprep.subr.bf16.mxu1 %v1033_v33  ;;  %v1098_v33 = vld [vmem:[#allocation10 + $0x28] sm:$0xff]  }
  0x96   :  { %653 = vmatpush1.bf16.msra.mxu0 %v1072_v60 }
  0x97   :  { %410 = vmatpush1.bf16.msra.mxu1 %v1035_v34  ;;  %654 = vmatprep.subr.bf16.mxu0 %v1077_v61  ;;  %v209_v34 = vld [vmem:[%s1422_s4] sm:$0x3] }
  0x98   :  { %411 = vmatprep.subr.bf16.mxu1 %v1036_v35  ;;  %v214_v35 = vrot.slane %v209_v34, %v1381_v3 }
  0x9a   :  { %655 = vmatpush1.bf16.msra.mxu0 %v1075_v62 }
  0x9b   :  { %412 = vmatpush1.bf16.msra.mxu1 %v1038_v36  ;;  %656 = vmatprep.subr.bf16.mxu0 %v1080_v63  ;;  %v218_v36 = vrot.slane %v209_v34, %v1386_v5 }
  0x9c   :  { %955 = vmatprep.subr.bf16.mxu1 %v1087_v22 }
  0x9e   :  { %657 = vmatpush1.bf16.msra.mxu0 %v1078_v0 }
  0x9f   :  { %658 = vmatprep.subr.bf16.mxu0 %v1083_v18 }
  0xa2   :  { %659 = vmatpush1.bf16.msra.mxu0 %v1081_v19 }
  0xa3   :  { %660 = vmatprep.subr.bf16.mxu0 %v1086_v20 }
  0xa6   :  { %661 = vmatpush1.bf16.msra.mxu0 %v1084_v21 }
 0x134   :  { %v166_v8 = vpop.f32.mrb[0].mxu0 }
 0x135   :  { %v167_v9 = vadd.f32 %v166_v8, %v111_v6  ;;  %v168_v10 = vpop.f32.mrb[1].mxu0 }
 0x136   :  { %v169_v11 = vadd.f32 %v168_v10, %v115_v7  ;;  %v170_v12 = vpop.f32.mrb[2].mxu0 }
 0x137   :  { %v173_v13 = vmax.f32 %v167_v9, 0.0  ;;  %v171_v14 = vpop.f32.mrb[3].mxu0 }
 0x138   :  { %v174_v15 = vmax.f32 %v169_v11, 0.0 }
 0x139   :  { %v175_v17 = vpack.c.bf16 %v173_v13, %v173_v13 }
 0x13a   :  { %v176_v16 = vpack.c.bf16 %v174_v15, %v174_v15 }
 0x13c   :  { %413 = vmatprep.mubr.bf16.mxu1 %v176_v16 }
 0x13d   :  { %414 = vmatmul.mubr.bf16.vlgmr.msra.gmra.mrb[0].mxu1 %v175_v17 }
 0x13e   :  { %956 = vmatpush3.bf16.msra.mxu1 %v1088_v23 }
 0x13f   :  { %957 = vmatprep.subr.bf16.mxu1 %v1089_v24 }
 0x142   :  { %958 = vmatpush3.bf16.msra.mxu1 %v1090_v25 }
 0x143   :  { %959 = vmatprep.subr.bf16.mxu1 %v1091_v26 }
 0x146   :  { %960 = vmatpush3.bf16.msra.mxu1 %v1092_v27 }
 0x147   :  { %961 = vmatprep.subr.bf16.mxu1 %v1093_v28 }
 0x14a   :  { %962 = vmatpush3.bf16.msra.mxu1 %v1094_v29 }
 0x14b   :  { %963 = vmatprep.subr.bf16.mxu1 %v1095_v30 }
 0x14e   :  { %964 = vmatpush3.bf16.msra.mxu1 %v1096_v31 }
 0x14f   :  { %965 = vmatprep.subr.bf16.mxu1 %v1097_v32 }
 0x152   :  { %966 = vmatpush3.bf16.msra.mxu1 %v1098_v33 }
 0x153   :  { %967 = vmatprep.subr.bf16.mxu1 %v1099_v47 }
 0x156   :  { %968 = vmatpush3.bf16.msra.mxu1 %v1100_v48 }
 0x157   :  { %969 = vmatprep.subr.bf16.mxu1 %v1101_v49 }
 0x15a   :  { %970 = vmatpush3.bf16.msra.mxu1 %v1102_v50 }
 0x210   :  { %v415_v37 = vpop.f32.mrb[0].mxu1 }
 0x211   :  { %v416_v38 = vadd.f32 %v415_v37, %v214_v35  ;;  %v417_v39 = vpop.f32.mrb[1].mxu1 }
 0x212   :  { %v418_v40 = vadd.f32 %v417_v39, %v218_v36  ;;  %v419_v41 = vpop.f32.mrb[2].mxu1 }
 0x213   :  { %v422_v42 = vmax.f32 %v416_v38, 0.0  ;;  %v420_v43 = vpop.f32.mrb[3].mxu1 }
 0x214   :  { %v423_v44 = vmax.f32 %v418_v40, 0.0 }
 0x215   :  { %v424_v46 = vpack.c.bf16 %v422_v42, %v422_v42 }
 0x216   :  { %v425_v45 = vpack.c.bf16 %v423_v44, %v423_v44 }
 0x218   :  { %662 = vmatprep.mubr.bf16.mxu0 %v425_v45 }
 0x219   :  { %663 = vmatmul.mubr.bf16.vlgmr.msra.gmra.mrb[4].mxu0 %v424_v46 }
 0x2ec   :  { %v664_v54 = vpop.f32.mrb[4].mxu0 }
 0x2ed   :  { %v665_v55 = vadd.f32 %v664_v54, %v463_v52  ;;  %v666_v56 = vpop.f32.mrb[5].mxu0 }
 0x2ee   :  { %v667_v57 = vadd.f32 %v666_v56, %v467_v53  ;;  %v668_v58 = vpop.f32.mrb[6].mxu0 }
 0x2ef   :  { %v671_v59 = vmax.f32 %v665_v55, 0.0  ;;  %v669_v60 = vpop.f32.mrb[7].mxu0 }
 0x2f0   :  { %v672_v61 = vmax.f32 %v667_v57, 0.0 }
 0x2f1   :  { %v673_v63 = vpack.c.bf16 %v671_v59, %v671_v59 }
 0x2f2   :  { %v674_v62 = vpack.c.bf16 %v672_v61, %v672_v61 }
 0x2f4   :  { %842 = vmatprep.mubr.bf16.mxu1 %v674_v62 }
 0x2f5   :  { %843 = vmatmul.mubr.bf16.vlgmr.msra.gmra.mrb[4].mxu1 %v673_v63 }
 0x3c8   :  { %v971_v0 = vpop.f32.mrb[4].mxu1 }
 0x3c9   :  { %v972_v2 = vpop.f32.mrb[5].mxu1 }
 0x3ca   :  { %v973_v3 = vadd.f32 %v972_v2, %v971_v0  ;;  %v974_v4 = vpop.f32.mrb[6].mxu1 }
 0x3cb   :  { %v975_v5 = vpop.f32.mrb[7].mxu1 }
 0x3cc   :  { %v845_v6 = vadd.f32 %v973_v3, %v938_v1 }
 0x3ce   :  { %1103 = vtanh.f32 %v845_v6 }
 0x3d8   :  { %v1104_v7 = vpop.eup %1103 }
 0x3d9   :  { %851 = vst [vmem:[#allocation11] sm:$0xff] %v1104_v7 }
 0x3da   :  { %856 = vsyncadd [#allocation4], 64  ;;  %s1255_s6 = smov [#allocation11]  }
 0x3db   :  { %s857_s14 = sshll.u32 %s1255_s6, 4  ;;  %s858_s14 = int_to_ptr.vmem [resolvable:$true] %s857_s14 }
 0x3dc   :  { %s1215_s15 = scalar_lea.vmem %s858_s14, 64  ;;  %s1219_s16 = scalar_lea.vmem %s858_s14, 128 }
 0x3dd   :  { %p1216_p12 = scmp.ne.s32.totalorder %s858_s14, %s1215_s15  ;;  %p1220_p13 = scmp.lt.s32.totalorder %s858_s14, %s858_s14 }
 0x3de   :  { %p1221_p0 = scmp.lt.s32.totalorder %s1219_s16, %s1215_s15 }
 0x3e0   :  { %p1222_p1 = por %p1221_p0, %p1220_p13 }
 0x3e2   :  { %p1223_p2 = pnand %p1222_p1, %p1216_p12 }
 0x3e4   :  { %1226 = shalt.err (!%p1223_p2)
}
 0x3e5   :  { %s1227_s18 = scalar_lea.hbm %s1427_s9, 64 }
 0x3e6   :  { %p1228_p3 = scmp.ne.s32.totalorder %s1427_s9, %s1227_s18  ;;  %p1231_p4 = scmp.lt.u32.totalorder %s1227_s18, %s1427_s9 }
 0x3e8   :  { %p1233_p5 = pnand %p1231_p4, %p1228_p3 }
 0x3ea   :  { %1236 = shalt.err (!%p1233_p5)
}
 0x3eb   :  { %863 = dma.vmem_to_hbm [thread:$0]  %s858_s14, 64, %s1427_s9, [#allocation4], %s1250_s5, %s1250_s5, %s1251_s24  }
 0x3ec   :  { %1243 = dma.done.wait [#allocation4], 128  }
 0x3ed   :  { %1244 = vsyncadd [#allocation4], 4294967168 }
 0x3ee   :  { %867 = vsyncpa [#allocation3], 1 }
 0x3ef   :  { %868 = vsyncpa [#allocation6], 1 }
 0x3f0   :  { %869 = vsyncpa [#allocation9], 1 }
 0x3f1   :  { %870 = vsyncpa [#allocation4], 1 }

</bundles_post_ra>
